<compile_context>
chip_gen: v7x
topology: tpu7x:2x2x1
jax: 0.10.0
libtpu: 0.0.40
codegen_flags: <defaults>
</compile_context>

<pallas_src>
import jax
import jax.numpy as jnp
from jax.experimental import pallas as pl
from jax.experimental.pallas import tpu as pltpu

EPS = 1e-5          # nn.BatchNorm1d default eps
NEG_SLOPE = 0.01    # nn.LeakyReLU default negative_slope
VMEM_LIMIT = 32 * 1024 * 1024   # explicit scoped-VMEM limit (safe on v5e/v6e/v7x)


def _bn(x, g, b):
    """BatchNorm1d (training mode) on (B, tn, C): stats over (B, C) per node channel.

    One-pass E[x^2] - mean^2 variance (biased), matching PyTorch's normalization.
    g, b have shape (tn, 1).
    """
    mean = jnp.mean(x, axis=(0, 2), keepdims=True)
    var = jnp.mean(x * x, axis=(0, 2), keepdims=True) - mean * mean
    var = jnp.maximum(var, 0.0)
    return (x - mean) * jax.lax.rsqrt(var + EPS) * g[None] + b[None]


def _p2_kernel(x_ref, w3_ref, g3_ref, b3_ref, o_ref):
    """K-side: part2 = bn_w3(W3(inputs.permute(0,2,3,1)).squeeze(-1)) -> (B, tn, T)."""
    B, tn, FT = x_ref.shape
    T = o_ref.shape[-1]
    x2d = x_ref[...].reshape(B * tn, FT)                               # leading-dim collapse
    p2 = jnp.dot(x2d, w3_ref[...], preferred_element_type=jnp.float32)  # (B*tn, T) on MXU
    o_ref[...] = _bn(p2.reshape(B, tn, T), g3_ref[...], b3_ref[...]).astype(o_ref.dtype)


def _attn_kernel(x_ref, p2_ref, w1_ref, w2t_ref, vwt_ref, vb_ref,
                 g1_ref, b1_ref, g2_ref, b2_ref, out_ref):
    """Query-tile path: produces softmax scores (B, tn, N) for this node tile."""
    B, tn, FT = x_ref.shape
    N = out_ref.shape[-1]
    T = p2_ref.shape[-1]

    x2d = x_ref[...].reshape(B * tn, FT)

    # part1 = bn_w1(W1(inputs.permute(0,2,1,3)).squeeze(-1))   -> (B, tn, F)
    p1 = jnp.dot(x2d, w1_ref[...], preferred_element_type=jnp.float32)  # (B*tn, F)
    p1 = _bn(p1.reshape(B, tn, -1), g1_ref[...], b1_ref[...])

    # part1 = bn_w2(W2(part1))                                 -> (B, tn, T)
    p1 = jnp.dot(p1.reshape(B * tn, -1), w2t_ref[...],
                 preferred_element_type=jnp.float32)                    # (B*tn, T)
    p1 = _bn(p1.reshape(B, tn, T), g2_ref[...], b2_ref[...])

    # score = bmm(part1, part2.permute(0,2,1))                 -> (B, tn, N)
    score = jnp.einsum('bnt,bmt->bnm', p1, p2_ref[...],
                       preferred_element_type=jnp.float32)

    # score = V(LeakyReLU(score)); batch collapsed into M for the V matmul.
    act = jnp.where(score > 0, score, NEG_SLOPE * score).reshape(B * tn, N)
    sc = jnp.dot(act, vwt_ref[...], preferred_element_type=jnp.float32)
    sc = sc.reshape(B, tn, N) + vb_ref[...]

    # clip then softmax over the last dim (exp on EUP, divide via approx reciprocal).
    sc = jnp.clip(sc, -10.0, 10.0)
    sc = sc - jnp.max(sc, axis=-1, keepdims=True)
    e = jnp.exp(sc)
    inv = pl.reciprocal(jnp.sum(e, axis=-1, keepdims=True), approx=True)
    out_ref[...] = (e * inv).astype(out_ref.dtype)


def _node_tile(n):
    """Largest multiple-of-8 tile dividing n, capped so the grid has >= 2 steps."""
    if n <= 8:
        return n
    cap = min(128, max(8, n // 2))
    best = 0
    for t in range(8, cap + 1, 8):
        if n % t == 0:
            best = t
    return best if best else n


def spatial_attention(x_bfnt, params):
    """x_bfnt: (B, in_features, num_nodes, in_len) -- PyTorch `inputs` layout."""
    w1, w2, w3, vw, vb, g1, b1, g2, b2, g3, b3 = params
    B, F, N, T = x_bfnt.shape
    FT = F * T
    tn = _node_tile(N)
    grid = (N // tn,)

    # ---- one-time glue (wrapper, outside the kernels) -------------------------------
    # x folded to a lane-dense (B, N, F*T) slab.
    xf = jnp.transpose(x_bfnt, (0, 2, 1, 3)).reshape(B, N, FT)
    # Block-structured weights so W1 (contract T per f) and W3 (contract F per t)
    # become plain 2-D matmuls against the folded x:
    #   W1big[f*T + t, f'] = w1[t] * delta(f, f')        -> (F*T, F)
    #   W3big[f*T + t, t'] = w3[f] * delta(t, t')        -> (F*T, T)
    eye_f = jnp.eye(F, dtype=xf.dtype)
    eye_t = jnp.eye(T, dtype=xf.dtype)
    w1big = jnp.kron(eye_f, w1.reshape(T, 1))
    w3big = jnp.kron(w3.reshape(F, 1), eye_t)
    w2t = w2.T                      # (F, T): part1 @ W2^T
    vwt = vw.T                      # (N, N): act @ V.weight^T
    vb2 = vb.reshape(1, N)
    col = lambda p: p.reshape(N, 1)

    cparams = pltpu.CompilerParams(dimension_semantics=("parallel",),
                                   vmem_limit_bytes=VMEM_LIMIT)

    # ---- kernel A: K-side part2 for all nodes (B, N, T) -----------------------------
    p2 = pl.pallas_call(
        _p2_kernel,
        out_shape=jax.ShapeDtypeStruct((B, N, T), jnp.float32),
        grid=grid,
        in_specs=[
            pl.BlockSpec((B, tn, FT), lambda i: (0, i, 0)),
            pl.BlockSpec((FT, T), lambda i: (0, 0)),
            pl.BlockSpec((tn, 1), lambda i: (i, 0)),
            pl.BlockSpec((tn, 1), lambda i: (i, 0)),
        ],
        out_specs=pl.BlockSpec((B, tn, T), lambda i: (0, i, 0)),
        compiler_params=cparams,
    )(xf, w3big, col(g3), col(b3))

    # ---- kernel B: query-tile attention scores (B, N, N) ----------------------------
    out = pl.pallas_call(
        _attn_kernel,
        out_shape=jax.ShapeDtypeStruct((B, N, N), jnp.float32),
        grid=grid,
        in_specs=[
            pl.BlockSpec((B, tn, FT), lambda i: (0, i, 0)),   # x query tile
            pl.BlockSpec((B, N, T), lambda i: (0, 0, 0)),     # part2, full K side (resident)
            pl.BlockSpec((FT, F), lambda i: (0, 0)),          # W1 (block-structured)
            pl.BlockSpec((F, T), lambda i: (0, 0)),           # W2^T
            pl.BlockSpec((N, N), lambda i: (0, 0)),           # V.weight^T
            pl.BlockSpec((1, N), lambda i: (0, 0)),           # V.bias
            pl.BlockSpec((tn, 1), lambda i: (i, 0)),          # bn_w1 gamma
            pl.BlockSpec((tn, 1), lambda i: (i, 0)),          # bn_w1 beta
            pl.BlockSpec((tn, 1), lambda i: (i, 0)),          # bn_w2 gamma
            pl.BlockSpec((tn, 1), lambda i: (i, 0)),          # bn_w2 beta
        ],
        out_specs=pl.BlockSpec((B, tn, N), lambda i: (0, i, 0)),
        compiler_params=cparams,
    )(xf, p2, w1big, w2t, vwt, vb2, col(g1), col(b1), col(g2), col(b2))

    return out


def reference(x_bfnt, params):
    """Pure-JAX mirror of the PyTorch forward for verification."""
    w1, w2, w3, vw, vb, g1, b1, g2, b2, g3, b3 = params

    def bn(t, g, b):
        mean = jnp.mean(t, axis=(0, 2), keepdims=True)
        var = jnp.mean((t - mean) ** 2, axis=(0, 2), keepdims=True)
        return (t - mean) / jnp.sqrt(var + EPS) * g.reshape(1, -1, 1) + b.reshape(1, -1, 1)

    part1 = jnp.transpose(x_bfnt, (0, 2, 1, 3))                    # (B, N, F, T)
    part2 = jnp.transpose(x_bfnt, (0, 2, 3, 1))                    # (B, N, T, F)
    p1 = bn(jnp.einsum('bnft,t->bnf', part1, w1), g1, b1)
    p1 = bn(jnp.einsum('bnf,tf->bnt', p1, w2), g2, b2)
    p2 = bn(jnp.einsum('bntf,f->bnt', part2, w3), g3, b3)
    p2 = jnp.transpose(p2, (0, 2, 1))
    score = jnp.einsum('bnt,btm->bnm', p1, p2)
    act = jnp.where(score > 0, score, NEG_SLOPE * score)
    score = jnp.einsum('bnm,km->bnk', act, vw) + vb.reshape(1, 1, -1)
    score = jnp.clip(score, -10.0, 10.0)
    return jax.nn.softmax(score, axis=-1)


if __name__ == "__main__":
    B, F, N, T = 2, 4, 16, 8   # batch, in_features, num_nodes, in_len

    key = jax.random.PRNGKey(0)
    ks = jax.random.split(key, 12)
    x = jax.random.normal(ks[0], (B, F, N, T), jnp.float32)

    # Deterministic parameter init (PyTorch-Linear-style uniform; non-trivial BN affine).
    w1 = jax.random.uniform(ks[1], (T,), jnp.float32, -1.0 / T ** 0.5, 1.0 / T ** 0.5)    # W1: (1, in_len)
    w2 = jax.random.uniform(ks[2], (T, F), jnp.float32, -1.0 / F ** 0.5, 1.0 / F ** 0.5)  # W2: (in_len, in_features)
    w3 = jax.random.uniform(ks[3], (F,), jnp.float32, -1.0 / F ** 0.5, 1.0 / F ** 0.5)    # W3: (1, in_features)
    vw = jax.random.uniform(ks[4], (N, N), jnp.float32, -1.0 / N ** 0.5, 1.0 / N ** 0.5)  # V.weight
    vb = jax.random.uniform(ks[5], (N,), jnp.float32, -1.0 / N ** 0.5, 1.0 / N ** 0.5)    # V.bias
    g1 = jax.random.uniform(ks[6], (N,), jnp.float32, 0.5, 1.5)
    b1 = jax.random.uniform(ks[7], (N,), jnp.float32, -0.5, 0.5)
    g2 = jax.random.uniform(ks[8], (N,), jnp.float32, 0.5, 1.5)
    b2 = jax.random.uniform(ks[9], (N,), jnp.float32, -0.5, 0.5)
    g3 = jax.random.uniform(ks[10], (N,), jnp.float32, 0.5, 1.5)
    b3 = jax.random.uniform(ks[11], (N,), jnp.float32, -0.5, 0.5)
    params = (w1, w2, w3, vw, vb, g1, b1, g2, b2, g3, b3)

    out = jax.block_until_ready(spatial_attention(x, params))
    ref = reference(x, params)

    assert out.shape == (B, N, N)
    # Tolerances account for the approx (EUP) reciprocal in the softmax epilogue.
    assert bool(jnp.allclose(jnp.sum(out, axis=-1), 1.0, atol=5e-3)), "rows must sum to 1"
    err = float(jnp.max(jnp.abs(out - ref)))
    assert err < 5e-3, f"mismatch vs reference: {err}"
    print("KERNEL_OK")
</pallas_src>

<mosaic_0001>
module attributes {stable_mosaic.version = 11 : i64} {
  func.func @_p2_kernel(%arg0: i32, %arg1: memref<2x8x32xf32, #tpu.memory_space<vmem>>, %arg2: memref<32x8xf32, #tpu.memory_space<vmem>>, %arg3: memref<8x1xf32, #tpu.memory_space<vmem>>, %arg4: memref<8x1xf32, #tpu.memory_space<vmem>>, %arg5: memref<2x8x8xf32, #tpu.memory_space<vmem>>) attributes {dimension_semantics = [#tpu.dimension_semantics<parallel>], iteration_bounds = array<i64: 2>, scalar_prefetch = 0 : i64, scratch_operands = 0 : i64, tpu.core_type = #tpu.core_type<tc>, window_params = [{transform_indices = @transform_0, window_bounds = array<i64: 2, 8, 32>}, {pipeline_mode = #tpu.pipeline_mode<synchronous>, transform_indices = @transform_1, window_bounds = array<i64: 32, 8>}, {transform_indices = @transform_2, window_bounds = array<i64: 8, 1>}, {transform_indices = @transform_3, window_bounds = array<i64: 8, 1>}, {transform_indices = @transform_4, window_bounds = array<i64: 2, 8, 8>}]} {
    %c0 = arith.constant 0 : index
    %c0_0 = arith.constant 0 : index
    %c0_1 = arith.constant 0 : index
    %0 = vector.load %arg1[%c0, %c0_0, %c0_1] : memref<2x8x32xf32, #tpu.memory_space<vmem>>, vector<2x8x32xf32>
    %1 = vector.shape_cast %0 : vector<2x8x32xf32> to vector<16x32xf32>
    %c0_2 = arith.constant 0 : index
    %c0_3 = arith.constant 0 : index
    %2 = vector.load %arg2[%c0_2, %c0_3] : memref<32x8xf32, #tpu.memory_space<vmem>>, vector<32x8xf32>
    %cst = arith.constant dense<0.000000e+00> : vector<16x8xf32>
    %3 = tpu.matmul %1, %2, %cst {dimension_numbers = #tpu.dot_dimension_numbers<[1], [0], [0], [1], [0, 0, 1, 1], [], []>} : vector<16x32xf32>, vector<32x8xf32>, vector<16x8xf32> -> vector<16x8xf32>
    %4 = vector.shape_cast %3 : vector<16x8xf32> to vector<2x8x8xf32>
    %c0_4 = arith.constant 0 : index
    %c0_5 = arith.constant 0 : index
    %5 = vector.load %arg3[%c0_4, %c0_5] : memref<8x1xf32, #tpu.memory_space<vmem>>, vector<8x1xf32>
    %c0_6 = arith.constant 0 : index
    %c0_7 = arith.constant 0 : index
    %6 = vector.load %arg4[%c0_6, %c0_7] : memref<8x1xf32, #tpu.memory_space<vmem>>, vector<8x1xf32>
    %cst_8 = arith.constant dense<0.000000e+00> : vector<8xf32>
    %7 = vector.multi_reduction <add>, %4, %cst_8 [0, 2] : vector<2x8x8xf32> to vector<8xf32>
    %8 = vector.shape_cast %7 : vector<8xf32> to vector<1x8x1xf32>
    %cst_9 = arith.constant 1.600000e+01 : f32
    %9 = vector.broadcast %cst_9 : f32 to vector<1x8x1xf32>
    %10 = arith.divf %8, %9 : vector<1x8x1xf32>
    %11 = arith.mulf %4, %4 : vector<2x8x8xf32>
    %cst_10 = arith.constant dense<0.000000e+00> : vector<8xf32>
    %12 = vector.multi_reduction <add>, %11, %cst_10 [0, 2] : vector<2x8x8xf32> to vector<8xf32>
    %13 = vector.shape_cast %12 : vector<8xf32> to vector<1x8x1xf32>
    %cst_11 = arith.constant 1.600000e+01 : f32
    %14 = vector.broadcast %cst_11 : f32 to vector<1x8x1xf32>
    %15 = arith.divf %13, %14 : vector<1x8x1xf32>
    %16 = arith.mulf %10, %10 : vector<1x8x1xf32>
    %17 = arith.subf %15, %16 : vector<1x8x1xf32>
    %cst_12 = arith.constant 0.000000e+00 : f32
    %18 = vector.broadcast %cst_12 : f32 to vector<1x8x1xf32>
    %19 = arith.maximumf %17, %18 : vector<1x8x1xf32>
    %20 = vector.broadcast %10 : vector<1x8x1xf32> to vector<2x8x8xf32>
    %21 = arith.subf %4, %20 : vector<2x8x8xf32>
    %cst_13 = arith.constant 9.99999974E-6 : f32
    %22 = vector.broadcast %cst_13 : f32 to vector<1x8x1xf32>
    %23 = arith.addf %19, %22 : vector<1x8x1xf32>
    %24 = math.rsqrt %23 : vector<1x8x1xf32>
    %25 = vector.broadcast %24 : vector<1x8x1xf32> to vector<2x8x8xf32>
    %26 = arith.mulf %21, %25 : vector<2x8x8xf32>
    %27 = vector.shape_cast %5 : vector<8x1xf32> to vector<1x8x1xf32>
    %28 = vector.broadcast %27 : vector<1x8x1xf32> to vector<2x8x8xf32>
    %29 = arith.mulf %26, %28 : vector<2x8x8xf32>
    %30 = vector.shape_cast %6 : vector<8x1xf32> to vector<1x8x1xf32>
    %31 = vector.broadcast %30 : vector<1x8x1xf32> to vector<2x8x8xf32>
    %32 = arith.addf %29, %31 : vector<2x8x8xf32>
    %c0_14 = arith.constant 0 : index
    %c0_15 = arith.constant 0 : index
    %c0_16 = arith.constant 0 : index
    %33 = vector.load %arg5[%c0_14, %c0_15, %c0_16] : memref<2x8x8xf32, #tpu.memory_space<vmem>>, vector<2x8x8xf32>
    tpu.vector_store %arg5[%c0_14, %c0_15, %c0_16], %32 {strides = array<i32>} : memref<2x8x8xf32, #tpu.memory_space<vmem>>, vector<2x8x8xf32>,
    return
  }
  func.func @transform_0(%arg0: i32) -> (i32, i32, i32) {
    %c0_i32 = arith.constant 0 : i32
    %c0_i32_0 = arith.constant 0 : i32
    %c0_i32_1 = arith.constant 0 : i32
    return %c0_i32, %arg0, %c0_i32_0 : i32, i32, i32
  }
  func.func @transform_1(%arg0: i32) -> (i32, i32) {
    %c0_i32 = arith.constant 0 : i32
    %c0_i32_0 = arith.constant 0 : i32
    %c0_i32_1 = arith.constant 0 : i32
    return %c0_i32, %c0_i32_0 : i32, i32
  }
  func.func @transform_2(%arg0: i32) -> (i32, i32) {
    %c0_i32 = arith.constant 0 : i32
    %c0_i32_0 = arith.constant 0 : i32
    return %arg0, %c0_i32 : i32, i32
  }
  func.func @transform_3(%arg0: i32) -> (i32, i32) {
    %c0_i32 = arith.constant 0 : i32
    %c0_i32_0 = arith.constant 0 : i32
    return %arg0, %c0_i32 : i32, i32
  }
  func.func @transform_4(%arg0: i32) -> (i32, i32, i32) {
    %c0_i32 = arith.constant 0 : i32
    %c0_i32_0 = arith.constant 0 : i32
    %c0_i32_1 = arith.constant 0 : i32
    return %c0_i32, %arg0, %c0_i32_0 : i32, i32, i32
  }
}

</mosaic_0001>

<bundles_post_ra>
// kernel: tpu_custom_call.1
= control target key start
LH: loop header
LB: loop body
LE: loop exit
PB: predicated region body
PF: predicated region fallthrough
CT: control target
= control target key end

     0   :  { %s641_s15 = smov 0   ;;  %s643_s16 = smov 0   ;;  %s721_s0 = inlined_call_operand.vmem [shape: f32[2,16,32], index: 0, kind: input, shape index: {}]   ;;  %s722_s1 = inlined_call_operand.vmem [shape: f32[32,8], index: 1, kind: input, shape index: {}]   ;;  %s723_s2 = inlined_call_operand.vmem [shape: f32[16,1], index: 2, kind: input, shape index: {}]   ;;  %s724_s3 = inlined_call_operand.vmem [shape: f32[16,1], index: 3, kind: input, shape index: {}]   ;;  %s725_s4 = inlined_call_operand.vmem [shape: f32[2,16,8], index: 4, kind: output, shape index: {}]  }
   0x1   :  { %s645_s17 = smov 0  }
   0x2 LB: > { %s654_s18 = sadd.s32 4294967295, %s613_s17   ;;  %s656_s19 = sadd.s32 1, %s613_s17   ;;  %s613_s17 = sphi %s645_s17, %s729_s17   ;;  %s609_s16 = sphi %s643_s16, %s728_s16   ;;  %s605_s15 = sphi %s641_s15, %s727_s15  }
   0x3   : > { %s18_s20 = ssub.s32 %s613_s17, %s656_s19  ;;  %s21_s21 = sadd.s32 1, %s609_s16 }
   0x4   : > { %p19_p0 = scmp.eq.s32.totalorder %s18_s20, 0  ;;  %p28_p1 = scmp.ne.s32.totalorder %s609_s16, %s605_s15 }
   0x5   : > { %p29_p2 = scmp.eq.s32.totalorder %s613_s17, 0  ;;  %p131_p3 = scmp.eq.s32.totalorder %s654_s18, 1 }
   0x6   : > { %s664_s22 = scalar_select %p19_p0, %s609_s16, %s21_s21  }
   0x7   : > { %p30_p4 = por %p29_p2, %p28_p1  ;;  %p666_p5 = por %p131_p3, %p28_p1 }
   0x8   : > { %p523_p6 = scmp.ge.s32.totalorder %s613_s17, 2 }
   0xa   : > { %156 = sbr.rel (%p523_p6) target bundleno = 24 (0x18), region = 20 }
  0x11   : > { %159 = sbr.rel (!%p30_p4) target bundleno = 24 (0x18), region = 24  ;;  %s161_s24 = sand.u32 (%p30_p4), 1, %s609_s16  }
  0x12   : > { %s525_s25 = sshll.u32 (%p30_p4), %s613_s17, 3  ;;  %s524_s26 = sshll.u32 (%p30_p4), %s161_s24, 4 }
  0x13   : > { %s165_s29 = scalar_lea.vmem (%p30_p4), %s721_s0, %s525_s25  ;;  %s163_s30 = scalar_lea.vmem (%p30_p4), [#allocation2], %s524_s26 }
  0x14   : > { %v195_v0 = vld [vmem:[%s165_s29] sm:$0xff] (%p30_p4)  ;;  %v197_v1 = vld [vmem:[%s165_s29 + $0x10] sm:$0xff] (%p30_p4) }
  0x15   : > { %196 = vst [vmem:[%s163_s30] sm:$0xff] (%p30_p4), %v195_v0  ;;  %198 = vst [vmem:[%s163_s30 + $0x8] sm:$0xff] (%p30_p4), %v197_v1 }
  0x18 PF: > { %p526_p7 = scmp.ge.s32.totalorder %s613_s17, 1  ;;  %p217_p8 = scmp.lt.s32.totalorder %s613_s17, 3 }
  0x1a   : > { %p218_p9 = pnand %p526_p7, %p217_p8 }
  0x1b   : > { %v266_v2 = vld [vmem:[%s722_s1] sm:$0xff] (!%p218_p9)  ;;  %v267_v3 = vld [vmem:[%s722_s1 + $0x8] sm:$0xff] (!%p218_p9)  ;;  %v268_v4 = vld [vmem:[%s722_s1 + $0x10] sm:$0xff] (!%p218_p9)  ;;  %s224_s11 = sand.u32 (!%p218_p9), 1, %s605_s15   ;;  %vm270_vm0 = vcmask (!%p218_p9), 261120   ;;  %p256_p10 = scmp.lt.s32.totalorder (!%p218_p9), %s654_s18, 1 }
  0x1c   : > { %221 = sbr.rel (%p218_p9) target bundleno = 434 (0x1b2), region = 70  ;;  %v554_v5 = vpack.c.bf16 (!%p218_p9), %v267_v3, %v266_v2  ;;  %v269_v6 = vld [vmem:[%s722_s1 + $0x18] sm:$0xff] (!%p218_p9)  ;;  %s687_s14 = sshll.u32 (!%p218_p9), %s224_s11, 4  ;;  %v615_v10 = vmov (!%p218_p9), 0   ;;  %vm354_vm1 = vcmask (!%p218_p9), 64512  }
  0x1d   : > { %v558_v7 = vpack.c.bf16 (!%p218_p9), %v269_v6, %v268_v4  ;;  %s226_s17 = scalar_lea.vmem (!%p218_p9), [#allocation2], %s687_s14  ;;  %587 = vset.pattern.permute.xlu1 (!%p218_p9), %v615_v10  ;;  %588 = vset.pattern.permute.xlu0 (!%p218_p9), %v615_v10  ;;  %s255_s29 = scalar_lea.vmem (!%p218_p9), [#allocation3], %s687_s14 }
  0x1e   : > { %555 = vmatprep.subr.bf16.mxu0 (!%p218_p9), %v554_v5  ;;  %v264_v8 = vld [vmem:[%s226_s17] sm:$0xff] (!%p218_p9)  ;;  %v265_v9 = vld [vmem:[%s226_s17 + $0x8] sm:$0xff] (!%p218_p9) }
  0x1f   : > { %557 = vmatpush3.bf16.msra.mxu0 (!%p218_p9), %v554_v5  ;;  %551 = vmatprep.mubr.msk.f32.mxu0 (!%p218_p9), %vm270_vm0, %v264_v8 }
  0x20   : > { %559 = vmatprep.subr.bf16.mxu0 (!%p218_p9), %v558_v7 }
  0x23   : > { %561 = vmatpush3.bf16.msra.mxu0 %v558_v7  ;;  %s257_s15 = scalar_select %p256_p10, %s654_s18, 1 }
  0x24   : > { %s534_s30 = sshll.u32 (%p666_p5), %s654_s18, 3 }
  0x25   : > { %s529_s20 = sshll.u32 %s257_s15, 3  ;;  %s403_s7 = scalar_lea.vmem (%p666_p5), %s725_s4, %s534_s30 }
  0x26   : > { %552 = vmatmul.mubr.msk.f32.vlgmr.msra.gmra.mrb[0].mxu0 %vm270_vm0, %v265_v9  ;;  %s259_s25 = scalar_lea.vmem %s723_s2, %s529_s20  ;;  %s263_s28 = scalar_lea.vmem %s724_s3, %s529_s20 }
  0x27   : > { %v352_v11 = vld [vmem:[%s259_s25] sm:$0xff] }
  0x28   : > { %381 = vperm.xlu1 %587, %v352_v11   ;;  %v353_v12 = vld [vmem:[%s263_s28] sm:$0xff] }
  0x2c   : > { %388 = vperm.xlu1 %587, %v353_v12  }
  0xa7   : > { %v382_v31 = vpop.permute.xlu1 %381 }
  0xab   : > { %v389_v39 = vpop.permute.xlu1 %388 }
  0xf9   : > { %v553_v13 = vpop.f32.mrb[0].mxu0 }
  0xfa   : > { %v363_v14 = vmul.f32 %v553_v13, %v553_v13  ;;  %v343_v15 = vpop.f32.mrb[1].mxu0  ;;  %v356_v16 = vsel %vm354_vm1, %v553_v13, 0.0 }
  0xfb   : > { %v362_v17 = vmul.f32 %v343_v15, %v343_v15  ;;  %v355_v18 = vsel %vm354_vm1, %v343_v15, 0.0 }
  0xfc   : > { %v357_v19 = vadd.f32 %v356_v16, %v355_v18  ;;  %v365_v20 = vsel %vm354_vm1, %v363_v14, 0.0 }
  0xfd   : > { %v364_v21 = vsel %vm354_vm1, %v362_v17, 0.0 }
  0xfe   : > { %358 = vadd.xlane.f32.xlu0 %v357_v19  ;;  %v366_v22 = vadd.f32 %v365_v20, %v364_v21 }
 0x102   : > { %367 = vadd.xlane.f32.xlu0 %v366_v22 }
 0x18b   : > { %v359_v23 = vpop.xlane.xlu0 %358 }
 0x18c   : > { %v361_v24 = vmul.f32 0.0625, %v359_v23 }
 0x18e   : > { %v370_v26 = vmul.f32 %v361_v24, %v361_v24  ;;  %v373_v32 = vsub.f32 %v343_v15, %v361_v24  ;;  %v374_v33 = vsub.f32 %v553_v13, %v361_v24 }
 0x18f   : > { %v368_v25 = vpop.xlane.xlu0 %367 }
 0x190   : > { %v369_v27 = vmul.f32 0.0625, %v368_v25 }
 0x192   : > { %v371_v28 = vsub.f32 %v369_v27, %v370_v26 }
 0x194   : > { %v372_v29 = vmax.f32 %v371_v28, 0.0 }
 0x196   : > { %v375_v30 = vadd.f32 1e-05, %v372_v29 }
 0x198   : > { %589 = vrsqrt.f32 %v375_v30 }
 0x1a2   : > { %v590_v34 = vpop.eup %589 }
 0x1a3   : > { %v377_v35 = vmul.f32 %v590_v34, %v373_v32  ;;  %v378_v36 = vmul.f32 %v590_v34, %v374_v33  ;;  %401 = sbr.rel (!%p666_p5) target bundleno = 434 (0x1b2), region = 78 }
 0x1a5   : > { %v384_v37 = vmul.f32 %v382_v31, %v377_v35  ;;  %v385_v38 = vmul.f32 %v382_v31, %v378_v36 }
 0x1a7   : > { %v391_v40 = vadd.f32 %v389_v39, %v384_v37  ;;  %v392_v41 = vadd.f32 %v389_v39, %v385_v38 }
 0x1a9   : > { %393 = vst.msk [vmem:[%s255_s29] sm:$0xff] %vm354_vm1, %v391_v40  ;;  %394 = vst.msk [vmem:[%s255_s29 + $0x8] sm:$0xff] %vm354_vm1, %v392_v41 }
 0x1b0   : > { %v433_v42 = vld [vmem:[%s255_s29] sm:$0xff]  ;;  %v435_v43 = vld [vmem:[%s255_s29 + $0x8] sm:$0xff] }
 0x1b1   : > { %434 = vst [vmem:[%s403_s7] sm:$0xff] %v433_v42  ;;  %436 = vst [vmem:[%s403_s7 + $0x10] sm:$0xff] %v435_v43 }
 0x1b2 PF: > { %p11_p11 = scmp.ge.s32.totalorder %s656_s19, 4   ;;  %s727_s15 = smov %s609_s16 }
 0x1b3   : > { %s728_s16 = smov %s664_s22  ;;  %s729_s17 = smov %s656_s19 }
 0x1b4   :  { %13 = sbr.rel (!%p11_p11) target bundleno = 2 (0x2), region = 153 }

</bundles_post_ra>
